<compile_context>
chip_gen: v5e
topology: v5e:2x2
jax: 0.10.0
libtpu: 0.0.40
codegen_flags: <defaults>
</compile_context>

<pallas_src>
import jax
import jax.numpy as jnp
from jax.experimental import pallas as pl
from jax.experimental.pallas import tpu as pltpu


def _concat_fusion_kernel(x_ref, y_ref, wxT_ref, wyT_ref, b_ref, o_ref):
    # output_tile = x_tile @ Wx.T + y_tile @ Wy.T + b
    acc = jnp.dot(x_ref[...], wxT_ref[...], preferred_element_type=jnp.float32)
    acc = acc + jnp.dot(y_ref[...], wyT_ref[...], preferred_element_type=jnp.float32)
    o_ref[...] = (acc + b_ref[...]).astype(o_ref.dtype)


def concat_fusion_forward(x, y, weight, bias, *, max_row_tile=512):
    """Pallas equivalent of ConcatFusion.forward.

    x, y:    (N, D) float32
    weight:  (O, 2*D) float32   (nn.Linear weight for the concatenated input)
    bias:    (O,) float32
    Returns (x, y, output) with output of shape (N, O).
    """
    N, D = x.shape
    assert y.shape == (N, D)
    O, two_d = weight.shape
    assert two_d == 2 * D

    # Split the fc_out weight so the concat never has to exist in memory:
    #   cat(x, y, dim=1) @ W.T == x @ W[:, :D].T + y @ W[:, D:].T
    wxT = weight[:, :D].T            # (D, O)
    wyT = weight[:, D:].T            # (D, O)
    b2 = bias.reshape(1, O)

    # Big row tiles amortize per-grid-step overhead; pad the tail instead of asserting.
    row_tile = min(max_row_tile, ((N + 7) // 8) * 8)
    n_pad = pl.cdiv(N, row_tile) * row_tile
    if n_pad != N:
        pad = n_pad - N
        xp = jnp.pad(x, ((0, pad), (0, 0)))
        yp = jnp.pad(y, ((0, pad), (0, 0)))
    else:
        xp, yp = x, y

    weight_spec = pl.BlockSpec((D, O), lambda i: (0, 0))
    bias_spec = pl.BlockSpec((1, O), lambda i: (0, 0))

    out = pl.pallas_call(
        _concat_fusion_kernel,
        out_shape=jax.ShapeDtypeStruct((n_pad, O), x.dtype),
        grid_spec=pltpu.PrefetchScalarGridSpec(
            num_scalar_prefetch=0,
            grid=(n_pad // row_tile,),
            in_specs=[
                pl.BlockSpec((row_tile, D), lambda i: (i, 0)),   # x tile
                pl.BlockSpec((row_tile, D), lambda i: (i, 0)),   # y tile
                weight_spec,                                     # Wx.T (resident)
                weight_spec,                                     # Wy.T (resident)
                bias_spec,                                       # bias
            ],
            out_specs=pl.BlockSpec((row_tile, O), lambda i: (i, 0)),
        ),
        compiler_params=pltpu.CompilerParams(
            dimension_semantics=("parallel",)),
    )(xp, yp, wxT, wyT, b2)

    if n_pad != N:
        out = out[:N]

    # ConcatFusion.forward returns (x, y, output); x and y are pure pass-throughs.
    return x, y, out


def _reference(x, y, weight, bias):
    return jnp.concatenate([x, y], axis=1) @ weight.T + bias


if __name__ == "__main__":
    # Small shapes consistent with the module (default is input_dim=768, output_dim=2).
    input_dim = 128     # lane-aligned, small stand-in for 768
    output_dim = 2
    batch = 16

    key = jax.random.PRNGKey(0)
    kx, ky, kw, kb = jax.random.split(key, 4)
    x = jax.random.normal(kx, (batch, input_dim), jnp.float32)
    y = jax.random.normal(ky, (batch, input_dim), jnp.float32)
    weight = jax.random.normal(kw, (output_dim, 2 * input_dim), jnp.float32) * 0.02
    bias = jax.random.normal(kb, (output_dim,), jnp.float32) * 0.01

    xo, yo, out = concat_fusion_forward(x, y, weight, bias)
    out = jax.block_until_ready(out)

    ref = _reference(x, y, weight, bias)
    assert out.shape == (batch, output_dim)
    assert jnp.allclose(xo, x) and jnp.allclose(yo, y)
    assert jnp.allclose(out, ref, atol=1e-5, rtol=1e-5), "mismatch vs reference"

    print("KERNEL_OK")
</pallas_src>

<mosaic_0001>
module attributes {stable_mosaic.version = 11 : i64} {
  func.func @_concat_fusion_kernel(%arg0: i32, %arg1: memref<16x128xf32, #tpu.memory_space<vmem>>, %arg2: memref<16x128xf32, #tpu.memory_space<vmem>>, %arg3: memref<128x2xf32, #tpu.memory_space<vmem>>, %arg4: memref<128x2xf32, #tpu.memory_space<vmem>>, %arg5: memref<1x2xf32, #tpu.memory_space<vmem>>, %arg6: memref<16x2xf32, #tpu.memory_space<vmem>>) attributes {dimension_semantics = [#tpu.dimension_semantics<parallel>], iteration_bounds = array<i64: 1>, scalar_prefetch = 0 : i64, scratch_operands = 0 : i64, tpu.core_type = #tpu.core_type<tc>, window_params = [{transform_indices = @transform_0, window_bounds = array<i64: 16, 128>}, {transform_indices = @transform_1, window_bounds = array<i64: 16, 128>}, {pipeline_mode = #tpu.pipeline_mode<synchronous>, transform_indices = @transform_2, window_bounds = array<i64: 128, 2>}, {pipeline_mode = #tpu.pipeline_mode<synchronous>, transform_indices = @transform_3, window_bounds = array<i64: 128, 2>}, {pipeline_mode = #tpu.pipeline_mode<synchronous>, transform_indices = @transform_4, window_bounds = array<i64: 1, 2>}, {transform_indices = @transform_5, window_bounds = array<i64: 16, 2>}]} {
    %c0 = arith.constant 0 : index
    %c0_0 = arith.constant 0 : index
    %0 = vector.load %arg1[%c0, %c0_0] : memref<16x128xf32, #tpu.memory_space<vmem>>, vector<16x128xf32>
    %c0_1 = arith.constant 0 : index
    %c0_2 = arith.constant 0 : index
    %1 = vector.load %arg3[%c0_1, %c0_2] : memref<128x2xf32, #tpu.memory_space<vmem>>, vector<128x2xf32>
    %cst = arith.constant dense<0.000000e+00> : vector<16x2xf32>
    %2 = tpu.matmul %0, %1, %cst {dimension_numbers = #tpu.dot_dimension_numbers<[1], [0], [0], [1], [0, 0, 1, 1], [], []>} : vector<16x128xf32>, vector<128x2xf32>, vector<16x2xf32> -> vector<16x2xf32>
    %c0_3 = arith.constant 0 : index
    %c0_4 = arith.constant 0 : index
    %3 = vector.load %arg2[%c0_3, %c0_4] : memref<16x128xf32, #tpu.memory_space<vmem>>, vector<16x128xf32>
    %c0_5 = arith.constant 0 : index
    %c0_6 = arith.constant 0 : index
    %4 = vector.load %arg4[%c0_5, %c0_6] : memref<128x2xf32, #tpu.memory_space<vmem>>, vector<128x2xf32>
    %cst_7 = arith.constant dense<0.000000e+00> : vector<16x2xf32>
    %5 = tpu.matmul %3, %4, %cst_7 {dimension_numbers = #tpu.dot_dimension_numbers<[1], [0], [0], [1], [0, 0, 1, 1], [], []>} : vector<16x128xf32>, vector<128x2xf32>, vector<16x2xf32> -> vector<16x2xf32>
    %6 = arith.addf %2, %5 : vector<16x2xf32>
    %c0_8 = arith.constant 0 : index
    %c0_9 = arith.constant 0 : index
    %7 = vector.load %arg5[%c0_8, %c0_9] : memref<1x2xf32, #tpu.memory_space<vmem>>, vector<1x2xf32>
    %8 = vector.broadcast %7 : vector<1x2xf32> to vector<16x2xf32>
    %9 = arith.addf %6, %8 : vector<16x2xf32>
    %c0_10 = arith.constant 0 : index
    %c0_11 = arith.constant 0 : index
    %10 = vector.load %arg6[%c0_10, %c0_11] : memref<16x2xf32, #tpu.memory_space<vmem>>, vector<16x2xf32>
    tpu.vector_store %arg6[%c0_10, %c0_11], %9 {strides = array<i32>} : memref<16x2xf32, #tpu.memory_space<vmem>>, vector<16x2xf32>,
    return
  }
  func.func @transform_0(%arg0: i32) -> (i32, i32) {
    %c0_i32 = arith.constant 0 : i32
    %c0_i32_0 = arith.constant 0 : i32
    return %arg0, %c0_i32 : i32, i32
  }
  func.func @transform_1(%arg0: i32) -> (i32, i32) {
    %c0_i32 = arith.constant 0 : i32
    %c0_i32_0 = arith.constant 0 : i32
    return %arg0, %c0_i32 : i32, i32
  }
  func.func @transform_2(%arg0: i32) -> (i32, i32) {
    %c0_i32 = arith.constant 0 : i32
    %c0_i32_0 = arith.constant 0 : i32
    %c0_i32_1 = arith.constant 0 : i32
    return %c0_i32, %c0_i32_0 : i32, i32
  }
  func.func @transform_3(%arg0: i32) -> (i32, i32) {
    %c0_i32 = arith.constant 0 : i32
    %c0_i32_0 = arith.constant 0 : i32
    %c0_i32_1 = arith.constant 0 : i32
    return %c0_i32, %c0_i32_0 : i32, i32
  }
  func.func @transform_4(%arg0: i32) -> (i32, i32) {
    %c0_i32 = arith.constant 0 : i32
    %c0_i32_0 = arith.constant 0 : i32
    %c0_i32_1 = arith.constant 0 : i32
    return %c0_i32, %c0_i32_0 : i32, i32
  }
  func.func @transform_5(%arg0: i32) -> (i32, i32) {
    %c0_i32 = arith.constant 0 : i32
    %c0_i32_0 = arith.constant 0 : i32
    return %arg0, %c0_i32 : i32, i32
  }
}

</mosaic_0001>

<bundles_post_ra>
// kernel: tpu_custom_call.1
= control target key start
LH: loop header
LB: loop body
LE: loop exit
PB: predicated region body
PF: predicated region fallthrough
CT: control target
= control target key end

     0   :  { %vm108_vm0 = vcmask 15360   ;;  %s295_s3 = inlined_call_operand.vmem [shape: f32[128,2], index: 3, kind: input, shape index: {}]   ;;  %s296_s2 = inlined_call_operand.vmem [shape: f32[128,2], index: 2, kind: input, shape index: {}]   ;;  %s297_s1 = inlined_call_operand.vmem [shape: f32[16,128], index: 1, kind: input, shape index: {}]   ;;  %s298_s0 = inlined_call_operand.vmem [shape: f32[16,128], index: 0, kind: input, shape index: {}]   ;;  %s299_s4 = inlined_call_operand.vmem [shape: f32[1,2], index: 4, kind: input, shape index: {}]   ;;  %s300_s5 = inlined_call_operand.vmem [shape: f32[16,2], index: 5, kind: output, shape index: {}]  }
   0x1   :  { %v55_v0 = vld [vmem:[%s295_s3 + $0x78] sm:$0xff]  ;;  %v54_v2 = vld [vmem:[%s295_s3 + $0x70] sm:$0xff]  ;;  %v53_v4 = vld [vmem:[%s295_s3 + $0x68] sm:$0xff] }
   0x2   :  { %v37_v1 = vld [vmem:[%s296_s2 + $0x78] sm:$0xff]  ;;  %115 = vmatpush.msra.mxu2 %v55_v0  ;;  %v36_v3 = vld [vmem:[%s296_s2 + $0x70] sm:$0xff]  ;;  %v35_v5 = vld [vmem:[%s296_s2 + $0x68] sm:$0xff]  ;;  %56 = vmatpush.msra.mxu0 %v55_v0 }
   0x3   :  { %131 = vmatpush.msra.mxu3 %v37_v1  ;;  %79 = vmatpush.msra.mxu1 %v37_v1  ;;  %v52_v6 = vld [vmem:[%s295_s3 + $0x60] sm:$0xff]  ;;  %v51_v8 = vld [vmem:[%s295_s3 + $0x58] sm:$0xff]  ;;  %v50_v10 = vld [vmem:[%s295_s3 + $0x50] sm:$0xff] }
   0x4   :  { %116 = vmatpush.msra.mxu2 %v54_v2  ;;  %v34_v7 = vld [vmem:[%s296_s2 + $0x60] sm:$0xff]  ;;  %57 = vmatpush.msra.mxu0 %v54_v2  ;;  %v33_v9 = vld [vmem:[%s296_s2 + $0x58] sm:$0xff]  ;;  %v32_v11 = vld [vmem:[%s296_s2 + $0x50] sm:$0xff] }
   0x5   :  { %132 = vmatpush.msra.mxu3 %v36_v3  ;;  %80 = vmatpush.msra.mxu1 %v36_v3  ;;  %v49_v12 = vld [vmem:[%s295_s3 + $0x48] sm:$0xff]  ;;  %v48_v14 = vld [vmem:[%s295_s3 + $0x40] sm:$0xff]  ;;  %v47_v16 = vld [vmem:[%s295_s3 + $0x38] sm:$0xff] }
   0x6   :  { %117 = vmatpush.msra.mxu2 %v53_v4  ;;  %58 = vmatpush.msra.mxu0 %v53_v4  ;;  %v31_v13 = vld [vmem:[%s296_s2 + $0x48] sm:$0xff]  ;;  %v30_v15 = vld [vmem:[%s296_s2 + $0x40] sm:$0xff]  ;;  %v29_v17 = vld [vmem:[%s296_s2 + $0x38] sm:$0xff] }
   0x7   :  { %133 = vmatpush.msra.mxu3 %v35_v5  ;;  %81 = vmatpush.msra.mxu1 %v35_v5  ;;  %v46_v18 = vld [vmem:[%s295_s3 + $0x30] sm:$0xff]  ;;  %v45_v20 = vld [vmem:[%s295_s3 + $0x28] sm:$0xff]  ;;  %v44_v22 = vld [vmem:[%s295_s3 + $0x20] sm:$0xff] }
   0x8   :  { %118 = vmatpush.msra.mxu2 %v52_v6  ;;  %59 = vmatpush.msra.mxu0 %v52_v6  ;;  %v28_v19 = vld [vmem:[%s296_s2 + $0x30] sm:$0xff]  ;;  %v27_v21 = vld [vmem:[%s296_s2 + $0x28] sm:$0xff]  ;;  %v26_v23 = vld [vmem:[%s296_s2 + $0x20] sm:$0xff] }
   0x9   :  { %134 = vmatpush.msra.mxu3 %v34_v7  ;;  %82 = vmatpush.msra.mxu1 %v34_v7  ;;  %v43_v24 = vld [vmem:[%s295_s3 + $0x18] sm:$0xff]  ;;  %v42_v26 = vld [vmem:[%s295_s3 + $0x10] sm:$0xff]  ;;  %v41_v28 = vld [vmem:[%s295_s3 + $0x8] sm:$0xff] }
   0xa   :  { %119 = vmatpush.msra.mxu2 %v51_v8  ;;  %60 = vmatpush.msra.mxu0 %v51_v8  ;;  %v25_v25 = vld [vmem:[%s296_s2 + $0x18] sm:$0xff]  ;;  %v24_v27 = vld [vmem:[%s296_s2 + $0x10] sm:$0xff]  ;;  %v23_v29 = vld [vmem:[%s296_s2 + $0x8] sm:$0xff] }
   0xb   :  { %135 = vmatpush.msra.mxu3 %v33_v9  ;;  %83 = vmatpush.msra.mxu1 %v33_v9  ;;  %v40_v30 = vld [vmem:[%s295_s3] sm:$0xff]  ;;  %v39_v32 = vld [vmem:[%s297_s1 + $0x8] sm:$0xff] }
   0xc   :  { %120 = vmatpush.msra.mxu2 %v50_v10  ;;  %61 = vmatpush.msra.mxu0 %v50_v10  ;;  %v22_v31 = vld [vmem:[%s296_s2] sm:$0xff]  ;;  %v21_v33 = vld [vmem:[%s298_s0 + $0x8] sm:$0xff] }
   0xd   :  { %136 = vmatpush.msra.mxu3 %v32_v11  ;;  %84 = vmatpush.msra.mxu1 %v32_v11  ;;  %v38_v34 = vld [vmem:[%s297_s1] sm:$0xff] }
   0xe   :  { %121 = vmatpush.msra.mxu2 %v49_v12  ;;  %62 = vmatpush.msra.mxu0 %v49_v12  ;;  %v20_v35 = vld [vmem:[%s298_s0] sm:$0xff] }
   0xf   :  { %137 = vmatpush.msra.mxu3 %v31_v13  ;;  %85 = vmatpush.msra.mxu1 %v31_v13  ;;  %v147_v36 = vld [vmem:[%s299_s4] ss:$0 sm:$0xff] }
  0x10   :  { %122 = vmatpush.msra.mxu2 %v48_v14  ;;  %63 = vmatpush.msra.mxu0 %v48_v14 }
  0x11   :  { %138 = vmatpush.msra.mxu3 %v30_v15  ;;  %86 = vmatpush.msra.mxu1 %v30_v15 }
  0x12   :  { %123 = vmatpush.msra.mxu2 %v47_v16  ;;  %64 = vmatpush.msra.mxu0 %v47_v16 }
  0x13   :  { %139 = vmatpush.msra.mxu3 %v29_v17  ;;  %87 = vmatpush.msra.mxu1 %v29_v17 }
  0x14   :  { %124 = vmatpush.msra.mxu2 %v46_v18  ;;  %65 = vmatpush.msra.mxu0 %v46_v18 }
  0x15   :  { %140 = vmatpush.msra.mxu3 %v28_v19  ;;  %88 = vmatpush.msra.mxu1 %v28_v19 }
  0x16   :  { %125 = vmatpush.msra.mxu2 %v45_v20  ;;  %66 = vmatpush.msra.mxu0 %v45_v20 }
  0x17   :  { %141 = vmatpush.msra.mxu3 %v27_v21  ;;  %89 = vmatpush.msra.mxu1 %v27_v21 }
  0x18   :  { %126 = vmatpush.msra.mxu2 %v44_v22  ;;  %67 = vmatpush.msra.mxu0 %v44_v22 }
  0x19   :  { %142 = vmatpush.msra.mxu3 %v26_v23  ;;  %90 = vmatpush.msra.mxu1 %v26_v23 }
  0x1a   :  { %127 = vmatpush.msra.mxu2 %v43_v24  ;;  %68 = vmatpush.msra.mxu0 %v43_v24 }
  0x1b   :  { %143 = vmatpush.msra.mxu3 %v25_v25  ;;  %91 = vmatpush.msra.mxu1 %v25_v25 }
  0x1c   :  { %128 = vmatpush.msra.mxu2 %v42_v26  ;;  %69 = vmatpush.msra.mxu0 %v42_v26 }
  0x1d   :  { %144 = vmatpush.msra.mxu3 %v24_v27  ;;  %92 = vmatpush.msra.mxu1 %v24_v27 }
  0x1e   :  { %129 = vmatpush.msra.mxu2 %v41_v28  ;;  %70 = vmatpush.msra.mxu0 %v41_v28 }
  0x1f   :  { %145 = vmatpush.msra.mxu3 %v23_v29  ;;  %93 = vmatpush.msra.mxu1 %v23_v29 }
  0x20   :  { %130 = vmatpush.msra.mxu2 %v40_v30  ;;  %71 = vmatpush.msra.mxu0 %v40_v30 }
  0x21   :  { %146 = vmatpush.msra.mxu3 %v22_v31  ;;  %75 = vmatmul.f32.vlgmr.msra.gmra.mxu2 %v39_v32 }
  0x22   :  { %98 = vmatmul.f32.vlgmr.msra.gmra.mxu3 %v21_v33  ;;  %94 = vmatpush.msra.mxu1 %v22_v31 }
  0x23   :  { %72 = vmatmul.f32.vlgmr.msra.gmra.mxu0 %v38_v34  ;;  %95 = vmatmul.f32.vlgmr.msra.gmra.mxu1 %v20_v35 }
  0xa0   :  { %v73_v37 = vpop.f32.mrf.mxu0  ;;  %v96_v38 = vpop.f32.mrf.mxu1 }
  0xa1   :  { %v97_v39 = vadd.f32 %v96_v38, %v73_v37 }
  0xa3   :  { %v106_v40 = vadd.f32 %v147_v36, %v97_v39 }
  0xa4   :  { %v76_v41 = vpop.f32.mrf.mxu2 }
  0xa5   :  { %v99_v42 = vpop.f32.mrf.mxu3  ;;  %109 = vst.msk [vmem:[%s300_s5] sm:$0xff] %vm108_vm0, %v106_v40 }
  0xa6   :  { %v100_v43 = vadd.f32 %v99_v42, %v76_v41 }
  0xa8   :  { %v107_v44 = vadd.f32 %v147_v36, %v100_v43 }
  0xaa   :  { %110 = vst.msk [vmem:[%s300_s5 + $0x8] sm:$0xff] %vm108_vm0, %v107_v44 }

</bundles_post_ra>
